<compile_context>
chip_gen: v7x
topology: tpu7x:2x2x1
jax: 0.10.0
libtpu: 0.0.40
codegen_flags: <defaults>
</compile_context>

<pallas_src>
import jax
import jax.numpy as jnp
import numpy as np
from jax.experimental import pallas as pl
from jax.experimental.pallas import tpu as pltpu

HIDDEN_CHANNELS = 10
HIDDEN_DIMS = 10
KH = KW = 3
PAD = 2
H_IN = W_IN = 4
H_OUT = W_OUT = H_IN + 2 * PAD - KH + 1          # 6
P = H_OUT * W_OUT                                # 36 output positions
K = KH * KW                                      # 9 taps (in_channels = 1)
N_PIX = H_IN * W_IN                              # 16 input pixels
FLAT = HIDDEN_CHANNELS * P                       # 360
FLAT_PAD = 384                                   # 3 * 128 lanes (padded fc1 K dim)
EPS = 1e-5                                       # PyTorch LayerNorm default


def _round_up(x, m):
    return (x + m - 1) // m * m


def _build_gather():
    # G[s, k, p] = 1 iff input pixel s feeds conv tap k of output position p
    # under circular padding of 2 (padded index j -> original (j - 2) mod 4).
    G = np.zeros((N_PIX, K, P), np.float32)
    for oh in range(H_OUT):
        for ow in range(W_OUT):
            p = oh * W_OUT + ow
            for kh in range(KH):
                for kw in range(KW):
                    ih = (oh + kh - PAD) % H_IN
                    iw = (ow + kw - PAD) % W_IN
                    G[ih * W_IN + iw, kh * KW + kw, p] = 1.0
    return G


_GATHER = _build_gather()                        # (16, 9, 36) constant


# ----------------------------- Pallas kernel --------------------------------

def _layernorm(x, g, b):
    mu = jnp.mean(x, axis=-1, keepdims=True)
    var = jnp.mean((x - mu) ** 2, axis=-1, keepdims=True)          # biased var
    return (x - mu) * jax.lax.rsqrt(var + EPS) * g + b


def fused_forward_kernel(x_ref, wconv_ref, bconv_ref,
                         w1_ref, b1_ref, g1_ref, be1_ref,
                         w2_ref, b2_ref, g2_ref, be2_ref,
                         w3_ref, b3_ref, out_ref):
    # x_ref: (TB, 16)   wconv_ref: (16, 384)   out_ref: (TB, 2)
    # conv (circular pad + 3x3 + NCHW flatten) folded into one lane-dense matmul.
    h = jnp.dot(x_ref[...], wconv_ref[...], preferred_element_type=jnp.float32)
    h = jnp.maximum(h + bconv_ref[...], 0.0)                       # (TB, 384)
    # fc1 (K padded 360->384 with zeros) -> LN -> ReLU
    h = jnp.dot(h, w1_ref[...], preferred_element_type=jnp.float32) + b1_ref[...]
    h = jnp.maximum(_layernorm(h, g1_ref[...], be1_ref[...]), 0.0)
    # fc2 -> LN -> ReLU
    h = jnp.dot(h, w2_ref[...], preferred_element_type=jnp.float32) + b2_ref[...]
    h = jnp.maximum(_layernorm(h, g2_ref[...], be2_ref[...]), 0.0)
    # fc3
    out_ref[...] = jnp.dot(h, w3_ref[...],
                           preferred_element_type=jnp.float32) + b3_ref[...]


# ------------------------------- JAX glue ------------------------------------

def cnn_lbc_forward(x, params):
    B = x.shape[0]
    x_flat = x.reshape(B, N_PIX).astype(jnp.float32)

    # Fold conv weights into a dense (16 pixels -> 360 flat outputs) matrix and
    # pad the flat/feature axis to 384 lanes. Channel-major (c*36 + oh*6 + ow)
    # column ordering matches nn.Flatten on NCHW, so fc1 weights apply directly.
    wconv = jnp.einsum("skp,ck->scp", _GATHER, params["wc"])        # (16, C, P)
    wconv = wconv.reshape(N_PIX, FLAT)
    wconv = jnp.pad(wconv, ((0, 0), (0, FLAT_PAD - FLAT)))          # (16, 384)
    bconv = jnp.broadcast_to(params["bc"], (HIDDEN_CHANNELS, P)).reshape(1, FLAT)
    bconv = jnp.pad(bconv, ((0, 0), (0, FLAT_PAD - FLAT)))          # (1, 384)
    w1 = jnp.pad(params["w1"], ((0, FLAT_PAD - FLAT), (0, 0)))      # (384, 10)

    # Batch tile: sublane-aligned, capped so (inputs x 2 buffers + weights +
    # intermediates) stays well under the v7x 64 MiB VMEM budget.
    TB = 512 if B >= 512 else _round_up(B, 8)
    B_pad = _round_up(B, TB)
    if B_pad != B:
        x_flat = jnp.pad(x_flat, ((0, B_pad - B), (0, 0)))

    def full(shape):
        return pl.BlockSpec(shape, lambda i: (0,) * len(shape))

    out = pl.pallas_call(
        fused_forward_kernel,
        out_shape=jax.ShapeDtypeStruct((B_pad, 2), jnp.float32),
        grid=(B_pad // TB,),
        in_specs=[
            pl.BlockSpec((TB, N_PIX), lambda i: (i, 0)),            # x
            full((N_PIX, FLAT_PAD)),                                # wconv
            full((1, FLAT_PAD)),                                    # bconv
            full((FLAT_PAD, HIDDEN_DIMS)),                          # w1
            full((1, HIDDEN_DIMS)),                                 # b1
            full((1, HIDDEN_DIMS)),                                 # g1
            full((1, HIDDEN_DIMS)),                                 # be1
            full((HIDDEN_DIMS, HIDDEN_DIMS)),                       # w2
            full((1, HIDDEN_DIMS)),                                 # b2
            full((1, HIDDEN_DIMS)),                                 # g2
            full((1, HIDDEN_DIMS)),                                 # be2
            full((HIDDEN_DIMS, 2)),                                 # w3
            full((1, 2)),                                           # b3
        ],
        out_specs=pl.BlockSpec((TB, 2), lambda i: (i, 0)),
        compiler_params=pltpu.CompilerParams(
            dimension_semantics=("parallel",)),
    )(x_flat, wconv, bconv, w1, params["b1"], params["g1"], params["be1"],
      params["w2"], params["b2"], params["g2"], params["be2"],
      params["w3"], params["b3"])
    return out[:B]


# -------------------------- deterministic params -----------------------------

def init_params(key):
    ks = jax.random.split(key, 8)

    def nrm(k, shape, scale):
        return scale * jax.random.normal(k, shape, dtype=jnp.float32)

    return {
        # conv weight stored as (C_out, K) = reshape of (C_out, 1, 3, 3)
        "wc": nrm(ks[0], (HIDDEN_CHANNELS, K), 1.0 / np.sqrt(K)),
        "bc": nrm(ks[1], (HIDDEN_CHANNELS, 1), 0.1),
        # fc weights stored transposed relative to PyTorch: (in, out)
        "w1": nrm(ks[2], (FLAT, HIDDEN_DIMS), 1.0 / np.sqrt(FLAT)),
        "b1": nrm(ks[3], (1, HIDDEN_DIMS), 0.1),
        "g1": jnp.ones((1, HIDDEN_DIMS), jnp.float32),
        "be1": jnp.zeros((1, HIDDEN_DIMS), jnp.float32),
        "w2": nrm(ks[4], (HIDDEN_DIMS, HIDDEN_DIMS), 1.0 / np.sqrt(HIDDEN_DIMS)),
        "b2": nrm(ks[5], (1, HIDDEN_DIMS), 0.1),
        "g2": jnp.ones((1, HIDDEN_DIMS), jnp.float32),
        "be2": jnp.zeros((1, HIDDEN_DIMS), jnp.float32),
        "w3": nrm(ks[6], (HIDDEN_DIMS, 2), 1.0 / np.sqrt(HIDDEN_DIMS)),
        "b3": nrm(ks[7], (1, 2), 0.1),
    }


# ------------------------------ pure-JAX ref ----------------------------------

def reference_forward(x, params):
    B = x.shape[0]
    hp = jax.lax.Precision.HIGHEST
    xp = jnp.pad(x[:, 0], ((0, 0), (PAD, PAD), (PAD, PAD)), mode="wrap")[:, None]
    wc4 = params["wc"].reshape(HIDDEN_CHANNELS, 1, KH, KW)
    conv = jax.lax.conv_general_dilated(
        xp, wc4, (1, 1), "VALID",
        dimension_numbers=("NCHW", "OIHW", "NCHW"), precision=hp)
    conv = jnp.maximum(conv + params["bc"].reshape(1, HIDDEN_CHANNELS, 1, 1), 0.0)
    h = conv.reshape(B, FLAT)
    h = jnp.dot(h, params["w1"], precision=hp) + params["b1"]
    h = jnp.maximum(_layernorm(h, params["g1"], params["be1"]), 0.0)
    h = jnp.dot(h, params["w2"], precision=hp) + params["b2"]
    h = jnp.maximum(_layernorm(h, params["g2"], params["be2"]), 0.0)
    return jnp.dot(h, params["w3"], precision=hp) + params["b3"]


# ---------------------------------- main --------------------------------------

if __name__ == "__main__":
    key = jax.random.PRNGKey(0)
    kx, kp = jax.random.split(key)
    x = jax.random.normal(kx, (2, 1, H_IN, W_IN), dtype=jnp.float32)  # NCHW
    params = init_params(kp)

    out = jax.jit(cnn_lbc_forward)(x, params)
    out = jax.block_until_ready(out)

    ref = reference_forward(x, params)
    assert out.shape == (2, 2)
    # Much tighter than the previous 3e-2; headroom only for MXU f32 rounding.
    np.testing.assert_allclose(np.asarray(out), np.asarray(ref),
                               rtol=1e-3, atol=1e-3)
    print("KERNEL_OK")
</pallas_src>

<mosaic_0001>
module attributes {stable_mosaic.version = 11 : i64} {
  func.func @fused_forward_kernel(%arg0: i32, %arg1: memref<8x16xf32, #tpu.memory_space<vmem>>, %arg2: memref<16x384xf32, #tpu.memory_space<vmem>>, %arg3: memref<1x384xf32, #tpu.memory_space<vmem>>, %arg4: memref<384x10xf32, #tpu.memory_space<vmem>>, %arg5: memref<1x10xf32, #tpu.memory_space<vmem>>, %arg6: memref<1x10xf32, #tpu.memory_space<vmem>>, %arg7: memref<1x10xf32, #tpu.memory_space<vmem>>, %arg8: memref<10x10xf32, #tpu.memory_space<vmem>>, %arg9: memref<1x10xf32, #tpu.memory_space<vmem>>, %arg10: memref<1x10xf32, #tpu.memory_space<vmem>>, %arg11: memref<1x10xf32, #tpu.memory_space<vmem>>, %arg12: memref<10x2xf32, #tpu.memory_space<vmem>>, %arg13: memref<1x2xf32, #tpu.memory_space<vmem>>, %arg14: memref<8x2xf32, #tpu.memory_space<vmem>>) attributes {dimension_semantics = [#tpu.dimension_semantics<parallel>], iteration_bounds = array<i64: 1>, scalar_prefetch = 0 : i64, scratch_operands = 0 : i64, tpu.core_type = #tpu.core_type<tc>, window_params = [{transform_indices = @transform_0, window_bounds = array<i64: 8, 16>}, {pipeline_mode = #tpu.pipeline_mode<synchronous>, transform_indices = @transform_1, window_bounds = array<i64: 16, 384>}, {pipeline_mode = #tpu.pipeline_mode<synchronous>, transform_indices = @transform_2, window_bounds = array<i64: 1, 384>}, {pipeline_mode = #tpu.pipeline_mode<synchronous>, transform_indices = @transform_3, window_bounds = array<i64: 384, 10>}, {pipeline_mode = #tpu.pipeline_mode<synchronous>, transform_indices = @transform_4, window_bounds = array<i64: 1, 10>}, {pipeline_mode = #tpu.pipeline_mode<synchronous>, transform_indices = @transform_5, window_bounds = array<i64: 1, 10>}, {pipeline_mode = #tpu.pipeline_mode<synchronous>, transform_indices = @transform_6, window_bounds = array<i64: 1, 10>}, {pipeline_mode = #tpu.pipeline_mode<synchronous>, transform_indices = @transform_7, window_bounds = array<i64: 10, 10>}, {pipeline_mode = #tpu.pipeline_mode<synchronous>, transform_indices = @transform_8, window_bounds = array<i64: 1, 10>}, {pipeline_mode = #tpu.pipeline_mode<synchronous>, transform_indices = @transform_9, window_bounds = array<i64: 1, 10>}, {pipeline_mode = #tpu.pipeline_mode<synchronous>, transform_indices = @transform_10, window_bounds = array<i64: 1, 10>}, {pipeline_mode = #tpu.pipeline_mode<synchronous>, transform_indices = @transform_11, window_bounds = array<i64: 10, 2>}, {pipeline_mode = #tpu.pipeline_mode<synchronous>, transform_indices = @transform_12, window_bounds = array<i64: 1, 2>}, {transform_indices = @transform_13, window_bounds = array<i64: 8, 2>}]} {
    %c0 = arith.constant 0 : index
    %c0_0 = arith.constant 0 : index
    %0 = vector.load %arg1[%c0, %c0_0] : memref<8x16xf32, #tpu.memory_space<vmem>>, vector<8x16xf32>
    %c0_1 = arith.constant 0 : index
    %c0_2 = arith.constant 0 : index
    %1 = vector.load %arg2[%c0_1, %c0_2] : memref<16x384xf32, #tpu.memory_space<vmem>>, vector<16x384xf32>
    %cst = arith.constant dense<0.000000e+00> : vector<8x384xf32>
    %2 = tpu.matmul %0, %1, %cst {dimension_numbers = #tpu.dot_dimension_numbers<[1], [0], [0], [1], [0, 0, 1, 1], [], []>} : vector<8x16xf32>, vector<16x384xf32>, vector<8x384xf32> -> vector<8x384xf32>
    %c0_3 = arith.constant 0 : index
    %c0_4 = arith.constant 0 : index
    %3 = vector.load %arg3[%c0_3, %c0_4] : memref<1x384xf32, #tpu.memory_space<vmem>>, vector<1x384xf32>
    %4 = vector.broadcast %3 : vector<1x384xf32> to vector<8x384xf32>
    %5 = arith.addf %2, %4 : vector<8x384xf32>
    %cst_5 = arith.constant 0.000000e+00 : f32
    %6 = vector.broadcast %cst_5 : f32 to vector<8x384xf32>
    %7 = arith.maximumf %5, %6 : vector<8x384xf32>
    %c0_6 = arith.constant 0 : index
    %c0_7 = arith.constant 0 : index
    %8 = vector.load %arg4[%c0_6, %c0_7] : memref<384x10xf32, #tpu.memory_space<vmem>>, vector<384x10xf32>
    %cst_8 = arith.constant dense<0.000000e+00> : vector<8x10xf32>
    %9 = tpu.matmul %7, %8, %cst_8 {dimension_numbers = #tpu.dot_dimension_numbers<[1], [0], [0], [1], [0, 0, 1, 1], [], []>} : vector<8x384xf32>, vector<384x10xf32>, vector<8x10xf32> -> vector<8x10xf32>
    %c0_9 = arith.constant 0 : index
    %c0_10 = arith.constant 0 : index
    %10 = vector.load %arg5[%c0_9, %c0_10] : memref<1x10xf32, #tpu.memory_space<vmem>>, vector<1x10xf32>
    %11 = vector.broadcast %10 : vector<1x10xf32> to vector<8x10xf32>
    %12 = arith.addf %9, %11 : vector<8x10xf32>
    %c0_11 = arith.constant 0 : index
    %c0_12 = arith.constant 0 : index
    %13 = vector.load %arg6[%c0_11, %c0_12] : memref<1x10xf32, #tpu.memory_space<vmem>>, vector<1x10xf32>
    %c0_13 = arith.constant 0 : index
    %c0_14 = arith.constant 0 : index
    %14 = vector.load %arg7[%c0_13, %c0_14] : memref<1x10xf32, #tpu.memory_space<vmem>>, vector<1x10xf32>
    %cst_15 = arith.constant dense<0.000000e+00> : vector<8xf32>
    %15 = vector.multi_reduction <add>, %12, %cst_15 [1] : vector<8x10xf32> to vector<8xf32>
    %16 = vector.shape_cast %15 : vector<8xf32> to vector<8x1xf32>
    %cst_16 = arith.constant 1.000000e+01 : f32
    %17 = vector.broadcast %cst_16 : f32 to vector<8x1xf32>
    %18 = arith.divf %16, %17 : vector<8x1xf32>
    %19 = vector.broadcast %18 : vector<8x1xf32> to vector<8x10xf32>
    %20 = arith.subf %12, %19 : vector<8x10xf32>
    %21 = arith.mulf %20, %20 : vector<8x10xf32>
    %cst_17 = arith.constant dense<0.000000e+00> : vector<8xf32>
    %22 = vector.multi_reduction <add>, %21, %cst_17 [1] : vector<8x10xf32> to vector<8xf32>
    %23 = vector.shape_cast %22 : vector<8xf32> to vector<8x1xf32>
    %cst_18 = arith.constant 1.000000e+01 : f32
    %24 = vector.broadcast %cst_18 : f32 to vector<8x1xf32>
    %25 = arith.divf %23, %24 : vector<8x1xf32>
    %26 = vector.broadcast %18 : vector<8x1xf32> to vector<8x10xf32>
    %27 = arith.subf %12, %26 : vector<8x10xf32>
    %cst_19 = arith.constant 9.99999974E-6 : f32
    %28 = vector.broadcast %cst_19 : f32 to vector<8x1xf32>
    %29 = arith.addf %25, %28 : vector<8x1xf32>
    %30 = math.rsqrt %29 : vector<8x1xf32>
    %31 = vector.broadcast %30 : vector<8x1xf32> to vector<8x10xf32>
    %32 = arith.mulf %27, %31 : vector<8x10xf32>
    %33 = vector.broadcast %13 : vector<1x10xf32> to vector<8x10xf32>
    %34 = arith.mulf %32, %33 : vector<8x10xf32>
    %35 = vector.broadcast %14 : vector<1x10xf32> to vector<8x10xf32>
    %36 = arith.addf %34, %35 : vector<8x10xf32>
    %cst_20 = arith.constant 0.000000e+00 : f32
    %37 = vector.broadcast %cst_20 : f32 to vector<8x10xf32>
    %38 = arith.maximumf %36, %37 : vector<8x10xf32>
    %c0_21 = arith.constant 0 : index
    %c0_22 = arith.constant 0 : index
    %39 = vector.load %arg8[%c0_21, %c0_22] : memref<10x10xf32, #tpu.memory_space<vmem>>, vector<10x10xf32>
    %cst_23 = arith.constant dense<0.000000e+00> : vector<8x10xf32>
    %40 = tpu.matmul %38, %39, %cst_23 {dimension_numbers = #tpu.dot_dimension_numbers<[1], [0], [0], [1], [0, 0, 1, 1], [], []>} : vector<8x10xf32>, vector<10x10xf32>, vector<8x10xf32> -> vector<8x10xf32>
    %c0_24 = arith.constant 0 : index
    %c0_25 = arith.constant 0 : index
    %41 = vector.load %arg9[%c0_24, %c0_25] : memref<1x10xf32, #tpu.memory_space<vmem>>, vector<1x10xf32>
    %42 = vector.broadcast %41 : vector<1x10xf32> to vector<8x10xf32>
    %43 = arith.addf %40, %42 : vector<8x10xf32>
    %c0_26 = arith.constant 0 : index
    %c0_27 = arith.constant 0 : index
    %44 = vector.load %arg10[%c0_26, %c0_27] : memref<1x10xf32, #tpu.memory_space<vmem>>, vector<1x10xf32>
    %c0_28 = arith.constant 0 : index
    %c0_29 = arith.constant 0 : index
    %45 = vector.load %arg11[%c0_28, %c0_29] : memref<1x10xf32, #tpu.memory_space<vmem>>, vector<1x10xf32>
    %cst_30 = arith.constant dense<0.000000e+00> : vector<8xf32>
    %46 = vector.multi_reduction <add>, %43, %cst_30 [1] : vector<8x10xf32> to vector<8xf32>
    %47 = vector.shape_cast %46 : vector<8xf32> to vector<8x1xf32>
    %cst_31 = arith.constant 1.000000e+01 : f32
    %48 = vector.broadcast %cst_31 : f32 to vector<8x1xf32>
    %49 = arith.divf %47, %48 : vector<8x1xf32>
    %50 = vector.broadcast %49 : vector<8x1xf32> to vector<8x10xf32>
    %51 = arith.subf %43, %50 : vector<8x10xf32>
    %52 = arith.mulf %51, %51 : vector<8x10xf32>
    %cst_32 = arith.constant dense<0.000000e+00> : vector<8xf32>
    %53 = vector.multi_reduction <add>, %52, %cst_32 [1] : vector<8x10xf32> to vector<8xf32>
    %54 = vector.shape_cast %53 : vector<8xf32> to vector<8x1xf32>
    %cst_33 = arith.constant 1.000000e+01 : f32
    %55 = vector.broadcast %cst_33 : f32 to vector<8x1xf32>
    %56 = arith.divf %54, %55 : vector<8x1xf32>
    %57 = vector.broadcast %49 : vector<8x1xf32> to vector<8x10xf32>
    %58 = arith.subf %43, %57 : vector<8x10xf32>
    %cst_34 = arith.constant 9.99999974E-6 : f32
    %59 = vector.broadcast %cst_34 : f32 to vector<8x1xf32>
    %60 = arith.addf %56, %59 : vector<8x1xf32>
    %61 = math.rsqrt %60 : vector<8x1xf32>
    %62 = vector.broadcast %61 : vector<8x1xf32> to vector<8x10xf32>
    %63 = arith.mulf %58, %62 : vector<8x10xf32>
    %64 = vector.broadcast %44 : vector<1x10xf32> to vector<8x10xf32>
    %65 = arith.mulf %63, %64 : vector<8x10xf32>
    %66 = vector.broadcast %45 : vector<1x10xf32> to vector<8x10xf32>
    %67 = arith.addf %65, %66 : vector<8x10xf32>
    %cst_35 = arith.constant 0.000000e+00 : f32
    %68 = vector.broadcast %cst_35 : f32 to vector<8x10xf32>
    %69 = arith.maximumf %67, %68 : vector<8x10xf32>
    %c0_36 = arith.constant 0 : index
    %c0_37 = arith.constant 0 : index
    %70 = vector.load %arg12[%c0_36, %c0_37] : memref<10x2xf32, #tpu.memory_space<vmem>>, vector<10x2xf32>
    %cst_38 = arith.constant dense<0.000000e+00> : vector<8x2xf32>
    %71 = tpu.matmul %69, %70, %cst_38 {dimension_numbers = #tpu.dot_dimension_numbers<[1], [0], [0], [1], [0, 0, 1, 1], [], []>} : vector<8x10xf32>, vector<10x2xf32>, vector<8x2xf32> -> vector<8x2xf32>
    %c0_39 = arith.constant 0 : index
    %c0_40 = arith.constant 0 : index
    %72 = vector.load %arg13[%c0_39, %c0_40] : memref<1x2xf32, #tpu.memory_space<vmem>>, vector<1x2xf32>
    %73 = vector.broadcast %72 : vector<1x2xf32> to vector<8x2xf32>
    %74 = arith.addf %71, %73 : vector<8x2xf32>
    %c0_41 = arith.constant 0 : index
    %c0_42 = arith.constant 0 : index
    %75 = vector.load %arg14[%c0_41, %c0_42] : memref<8x2xf32, #tpu.memory_space<vmem>>, vector<8x2xf32>
    tpu.vector_store %arg14[%c0_41, %c0_42], %74 {strides = array<i32>} : memref<8x2xf32, #tpu.memory_space<vmem>>, vector<8x2xf32>,
    return
  }
  func.func @transform_0(%arg0: i32) -> (i32, i32) {
    %c0_i32 = arith.constant 0 : i32
    %c0_i32_0 = arith.constant 0 : i32
    return %arg0, %c0_i32 : i32, i32
  }
  func.func @transform_1(%arg0: i32) -> (i32, i32) {
    %c0_i32 = arith.constant 0 : i32
    %c0_i32_0 = arith.constant 0 : i32
    %c0_i32_1 = arith.constant 0 : i32
    return %c0_i32, %c0_i32_0 : i32, i32
  }
  func.func @transform_2(%arg0: i32) -> (i32, i32) {
    %c0_i32 = arith.constant 0 : i32
    %c0_i32_0 = arith.constant 0 : i32
    %c0_i32_1 = arith.constant 0 : i32
    return %c0_i32, %c0_i32_0 : i32, i32
  }
  func.func @transform_3(%arg0: i32) -> (i32, i32) {
    %c0_i32 = arith.constant 0 : i32
    %c0_i32_0 = arith.constant 0 : i32
    %c0_i32_1 = arith.constant 0 : i32
    return %c0_i32, %c0_i32_0 : i32, i32
  }
  func.func @transform_4(%arg0: i32) -> (i32, i32) {
    %c0_i32 = arith.constant 0 : i32
    %c0_i32_0 = arith.constant 0 : i32
    %c0_i32_1 = arith.constant 0 : i32
    return %c0_i32, %c0_i32_0 : i32, i32
  }
  func.func @transform_5(%arg0: i32) -> (i32, i32) {
    %c0_i32 = arith.constant 0 : i32
    %c0_i32_0 = arith.constant 0 : i32
    %c0_i32_1 = arith.constant 0 : i32
    return %c0_i32, %c0_i32_0 : i32, i32
  }
  func.func @transform_6(%arg0: i32) -> (i32, i32) {
    %c0_i32 = arith.constant 0 : i32
    %c0_i32_0 = arith.constant 0 : i32
    %c0_i32_1 = arith.constant 0 : i32
    return %c0_i32, %c0_i32_0 : i32, i32
  }
  func.func @transform_7(%arg0: i32) -> (i32, i32) {
    %c0_i32 = arith.constant 0 : i32
    %c0_i32_0 = arith.constant 0 : i32
    %c0_i32_1 = arith.constant 0 : i32
    return %c0_i32, %c0_i32_0 : i32, i32
  }
  func.func @transform_8(%arg0: i32) -> (i32, i32) {
    %c0_i32 = arith.constant 0 : i32
    %c0_i32_0 = arith.constant 0 : i32
    %c0_i32_1 = arith.constant 0 : i32
    return %c0_i32, %c0_i32_0 : i32, i32
  }
  func.func @transform_9(%arg0: i32) -> (i32, i32) {
    %c0_i32 = arith.constant 0 : i32
    %c0_i32_0 = arith.constant 0 : i32
    %c0_i32_1 = arith.constant 0 : i32
    return %c0_i32, %c0_i32_0 : i32, i32
  }
  func.func @transform_10(%arg0: i32) -> (i32, i32) {
    %c0_i32 = arith.constant 0 : i32
    %c0_i32_0 = arith.constant 0 : i32
    %c0_i32_1 = arith.constant 0 : i32
    return %c0_i32, %c0_i32_0 : i32, i32
  }
  func.func @transform_11(%arg0: i32) -> (i32, i32) {
    %c0_i32 = arith.constant 0 : i32
    %c0_i32_0 = arith.constant 0 : i32
    %c0_i32_1 = arith.constant 0 : i32
    return %c0_i32, %c0_i32_0 : i32, i32
  }
  func.func @transform_12(%arg0: i32) -> (i32, i32) {
    %c0_i32 = arith.constant 0 : i32
    %c0_i32_0 = arith.constant 0 : i32
    %c0_i32_1 = arith.constant 0 : i32
    return %c0_i32, %c0_i32_0 : i32, i32
  }
  func.func @transform_13(%arg0: i32) -> (i32, i32) {
    %c0_i32 = arith.constant 0 : i32
    %c0_i32_0 = arith.constant 0 : i32
    return %arg0, %c0_i32 : i32, i32
  }
}

</mosaic_0001>

<bundles_post_ra>
// kernel: cnn_lbc_forward.1
= control target key start
LH: loop header
LB: loop body
LE: loop exit
PB: predicated region body
PF: predicated region fallthrough
CT: control target
= control target key end

     0   :  { %v859_v3 = vmov 0.0   ;;  %v860_v4 = vmov 0.0|0.0   ;;  %vm861_vm0 = vmmov 0   ;;  %vm68_vm1 = vcmask 130048   ;;  %s1173_s1 = inlined_call_operand.vmem [shape: f32[16,384], index: 1, kind: input, shape index: {}]   ;;  %s1174_s3 = inlined_call_operand.vmem [shape: f32[384,10], index: 3, kind: input, shape index: {}]   ;;  %s1175_s0 = inlined_call_operand.vmem [shape: f32[8,16], index: 0, kind: input, shape index: {}]   ;;  %s1176_s2 = inlined_call_operand.vmem [shape: f32[1,384], index: 2, kind: input, shape index: {}]   ;;  %s1177_s4 = inlined_call_operand.vmem [shape: f32[1,10], index: 4, kind: input, shape index: {}]   ;;  %s1178_s7 = inlined_call_operand.vmem [shape: f32[10,10], index: 7, kind: input, shape index: {}]   ;;  %s1179_s5 = inlined_call_operand.vmem [shape: f32[1,10], index: 5, kind: input, shape index: {}]   ;;  %s1180_s6 = inlined_call_operand.vmem [shape: f32[1,10], index: 6, kind: input, shape index: {}]   ;;  %s1181_s8 = inlined_call_operand.vmem [shape: f32[1,10], index: 8, kind: input, shape index: {}]   ;;  %s1182_s11 = inlined_call_operand.vmem [shape: f32[10,2], index: 11, kind: input, shape index: {}]   ;;  %s1183_s9 = inlined_call_operand.vmem [shape: f32[1,10], index: 9, kind: input, shape index: {}]   ;;  %s1184_s10 = inlined_call_operand.vmem [shape: f32[1,10], index: 10, kind: input, shape index: {}]   ;;  %s1185_s12 = inlined_call_operand.vmem [shape: f32[1,2], index: 12, kind: input, shape index: {}]   ;;  %s1186_s13 = inlined_call_operand.vmem [shape: f32[8,2], index: 13, kind: output, shape index: {}]  }
   0x1   :  { %v46_v0 = vld [vmem:[%s1173_s1 + $0x8] sm:$0xff]  ;;  %v49_v1 = vld [vmem:[%s1173_s1 + $0x20] sm:$0xff]  ;;  %136 = vmatprep.mubr.f32.mxu0 %v859_v3  ;;  %784 = vmatprep.subr.bf16.mxu1 %v860_v4  ;;  %v48_v6 = vld [vmem:[%s1173_s1 + $0x18] sm:$0xff]  ;;  %vm413_vm2 = vcmask 80896   ;;  %vm455_vm3 = vcmask 1041408   ;;  %vm862_vm4 = vmmov 1  }
   0x2   :  { %v45_v2 = vld [vmem:[%s1173_s1] sm:$0xff]  ;;  %v780_v5 = vpack.c.bf16 %v49_v1, %v46_v0  ;;  %v47_v7 = vld [vmem:[%s1173_s1 + $0x10] sm:$0xff]  ;;  %728 = vmatprep.mubr.msk.f32.mxu1 %vm861_vm0, %v859_v3  ;;  %v50_v9 = vld [vmem:[%s1173_s1 + $0x28] sm:$0xff]  ;;  %vm644_vm6 = vcmask 15360  }
   0x3   :  { %v782_v8 = vpack.c.bf16 %v48_v6, %v45_v2  ;;  %v232_v10 = vld [vmem:[%s1174_s3 + $0x80] sm:$0xff]  ;;  %v233_v11 = vld [vmem:[%s1174_s3 + $0x88] sm:$0xff]  ;;  %v785_v12 = vpack.c.bf16 %v50_v9, %v47_v7  ;;  %v234_v16 = vld [vmem:[%s1174_s3 + $0x90] sm:$0xff] }
   0x4   :  { %781 = vmatprep.subr.bf16.mxu0 %v780_v5  ;;  %v787_v13 = vpack.c.bf16 %v233_v11, %v232_v10  ;;  %v216_v14 = vld [vmem:[%s1174_s3] sm:$0xff]  ;;  %v217_v15 = vld [vmem:[%s1174_s3 + $0x8] sm:$0xff]  ;;  %v235_v19 = vld [vmem:[%s1174_s3 + $0x98] sm:$0xff] }
   0x5   :  { %783 = vmatpush1.bf16.msra.mxu0 %v782_v8  ;;  %v44_v17 = vld [vmem:[%s1175_s0] sm:$0xff]  ;;  %v789_v18 = vpack.c.bf16 %v217_v15, %v216_v14  ;;  %v218_v20 = vld [vmem:[%s1174_s3 + $0x10] sm:$0xff]  ;;  %786 = vmatpush3.bf16.msra.mxu1 %v785_v12  ;;  %v791_v21 = vpack.c.bf16 %v235_v19, %v234_v16  ;;  %v219_v22 = vld [vmem:[%s1174_s3 + $0x18] sm:$0xff] }
   0x6   :  { %788 = vmatprep.subr.bf16.mxu0 %v787_v13  ;;  %v248_v23 = vld [vmem:[%s1174_s3 + $0x100] sm:$0xff]  ;;  %v249_v24 = vld [vmem:[%s1174_s3 + $0x108] sm:$0xff]  ;;  %819 = vmatprep.subr.bf16.mxu1 %v860_v4  ;;  %v250_v28 = vld [vmem:[%s1174_s3 + $0x110] sm:$0xff]  ;;  %v793_v30 = vpack.c.bf16 %v219_v22, %v218_v20  ;;  %v53_v22 = vlaneseq }
   0x7   :  { %v820_v25 = vpack.c.bf16 %v249_v24, %v248_v23  ;;  %v236_v26 = vld [vmem:[%s1174_s3 + $0xa0] sm:$0xff]  ;;  %v237_v27 = vld [vmem:[%s1174_s3 + $0xa8] sm:$0xff]  ;;  %v251_v29 = vld [vmem:[%s1174_s3 + $0x118] sm:$0xff] }
   0x8   :  { %650 = vmatmul.mubr.msk.f32.vlgmr.msra.gmra.mrb[0].mxu0 %vm68_vm1, %v44_v17  ;;  %729 = vmatmul.mubr.msk.f32.vlgmr.msra.gmra.mrb[0].mxu1 %vm68_vm1, %v44_v17  ;;  %v795_v31 = vpack.c.bf16 %v237_v27, %v236_v26  ;;  %v220_v32 = vld [vmem:[%s1174_s3 + $0x20] sm:$0xff]  ;;  %v221_v33 = vld [vmem:[%s1174_s3 + $0x28] sm:$0xff]  ;;  %v823_v34 = vpack.c.bf16 %v251_v29, %v250_v28  ;;  %v238_v35 = vld [vmem:[%s1174_s3 + $0xb0] sm:$0xff]  ;;  %v54_v23 = vshrl.u32 %v53_v22, 7 }
   0x9   :  { %790 = vmatpush3.bf16.msra.mxu0 %v789_v18  ;;  %821 = vmatpush3.bf16.msra.mxu1 %v820_v25  ;;  %v239_v36 = vld [vmem:[%s1174_s3 + $0xb8] sm:$0xff]  ;;  %v252_v37 = vld [vmem:[%s1174_s3 + $0x120] sm:$0xff]  ;;  %v253_v38 = vld [vmem:[%s1174_s3 + $0x128] sm:$0xff]  ;;  %v797_v39 = vpack.c.bf16 %v221_v33, %v220_v32 }
   0xa   :  { %792 = vmatprep.subr.bf16.mxu0 %v791_v21  ;;  %822 = vmatprep.subr.bf16.mxu1 %v860_v4  ;;  %v799_v40 = vpack.c.bf16 %v239_v36, %v238_v35  ;;  %v222_v41 = vld [vmem:[%s1174_s3 + $0x30] sm:$0xff]  ;;  %v223_v42 = vld [vmem:[%s1174_s3 + $0x38] sm:$0xff]  ;;  %v826_v43 = vpack.c.bf16 %v253_v38, %v252_v37  ;;  %v240_v44 = vld [vmem:[%s1174_s3 + $0xc0] sm:$0xff]  ;;  %v55_v24 = vsub.s32 0, %v54_v23  ;;  %v59_v26 = vsub.s32 1, %v54_v23 }
   0xb   :  { %763 = vmatprep.mubr.msk.f32.mxu1 %vm861_vm0, %v859_v3  ;;  %v241_v45 = vld [vmem:[%s1174_s3 + $0xc8] sm:$0xff]  ;;  %v254_v46 = vld [vmem:[%s1174_s3 + $0x130] sm:$0xff]  ;;  %v255_v47 = vld [vmem:[%s1174_s3 + $0x138] sm:$0xff]  ;;  %v801_v48 = vpack.c.bf16 %v223_v42, %v222_v41  ;;  %v63_v27 = vsub.s32 2, %v54_v23 }
   0xc   :  { %v803_v49 = vpack.c.bf16 %v241_v45, %v240_v44  ;;  %v224_v50 = vld [vmem:[%s1174_s3 + $0x40] sm:$0xff]  ;;  %v225_v51 = vld [vmem:[%s1174_s3 + $0x48] sm:$0xff]  ;;  %v829_v52 = vpack.c.bf16 %v255_v47, %v254_v46  ;;  %v242_v53 = vld [vmem:[%s1174_s3 + $0xd0] sm:$0xff] }
   0xd   :  { %794 = vmatpush3.bf16.msra.mxu0 %v793_v30  ;;  %824 = vmatpush3.bf16.msra.mxu1 %v823_v34  ;;  %v243_v54 = vld [vmem:[%s1174_s3 + $0xd8] sm:$0xff]  ;;  %v256_v55 = vld [vmem:[%s1174_s3 + $0x140] sm:$0xff]  ;;  %v257_v56 = vld [vmem:[%s1174_s3 + $0x148] sm:$0xff]  ;;  %v805_v57 = vpack.c.bf16 %v225_v51, %v224_v50 }
   0xe   :  { %796 = vmatprep.subr.bf16.mxu0 %v795_v31  ;;  %825 = vmatprep.subr.bf16.mxu1 %v860_v4  ;;  %v807_v58 = vpack.c.bf16 %v243_v54, %v242_v53  ;;  %v226_v59 = vld [vmem:[%s1174_s3 + $0x50] sm:$0xff]  ;;  %v227_v60 = vld [vmem:[%s1174_s3 + $0x58] sm:$0xff]  ;;  %v832_v61 = vpack.c.bf16 %v257_v56, %v256_v55  ;;  %v244_v62 = vld [vmem:[%s1174_s3 + $0xe0] sm:$0xff] }
   0xf   :  { %v245_v63 = vld [vmem:[%s1174_s3 + $0xe8] sm:$0xff]  ;;  %v809_v0 = vpack.c.bf16 %v227_v60, %v226_v59  ;;  %v228_v2 = vld [vmem:[%s1174_s3 + $0x60] sm:$0xff]  ;;  %v258_v6 = vld [vmem:[%s1174_s3 + $0x150] sm:$0xff] }
  0x10   :  { %v811_v1 = vpack.c.bf16 %v245_v63, %v244_v62  ;;  %v229_v5 = vld [vmem:[%s1174_s3 + $0x68] sm:$0xff]  ;;  %v259_v8 = vld [vmem:[%s1174_s3 + $0x158] sm:$0xff]  ;;  %v246_v10 = vld [vmem:[%s1174_s3 + $0xf0] sm:$0xff] }
  0x11   :  { %798 = vmatpush3.bf16.msra.mxu0 %v797_v39  ;;  %827 = vmatpush3.bf16.msra.mxu1 %v826_v43  ;;  %v813_v7 = vpack.c.bf16 %v229_v5, %v228_v2  ;;  %v835_v9 = vpack.c.bf16 %v259_v8, %v258_v6  ;;  %v247_v11 = vld [vmem:[%s1174_s3 + $0xf8] sm:$0xff]  ;;  %v230_v13 = vld [vmem:[%s1174_s3 + $0x70] sm:$0xff]  ;;  %v260_v15 = vld [vmem:[%s1174_s3 + $0x160] sm:$0xff] }
  0x12   :  { %800 = vmatprep.subr.bf16.mxu0 %v799_v40  ;;  %828 = vmatprep.subr.bf16.mxu1 %v860_v4  ;;  %v815_v12 = vpack.c.bf16 %v247_v11, %v246_v10  ;;  %v231_v14 = vld [vmem:[%s1174_s3 + $0x78] sm:$0xff]  ;;  %v261_v17 = vld [vmem:[%s1174_s3 + $0x168] sm:$0xff]  ;;  %v262_v19 = vld [vmem:[%s1174_s3 + $0x170] sm:$0xff] }
  0x13   :  { %v817_v16 = vpack.c.bf16 %v231_v14, %v230_v13  ;;  %v838_v18 = vpack.c.bf16 %v261_v17, %v260_v15  ;;  %v263_v20 = vld [vmem:[%s1174_s3 + $0x178] sm:$0xff]  ;;  %v51_v25 = vld [vmem:[%s1176_s2] sm:$0x7]  ;;  %v444_v54 = vld [vmem:[%s1178_s7 + $0x8] sm:$0x3] }
  0x14   :  { %v841_v21 = vpack.c.bf16 %v263_v20, %v262_v19  ;;  %v56_v28 = vrot.slane %v51_v25, %v55_v24  ;;  %v60_v29 = vrot.slane %v51_v25, %v59_v26  ;;  %v64_v30 = vrot.slane %v51_v25, %v63_v27  ;;  %v652_v44 = vld [vmem:[%s1177_s4] ss:$0 sm:$0xff]  ;;  %vm1134_vm5 = vmpackc.low %vm455_vm3, %vm862_vm4 }
  0x15   :  { %802 = vmatpush3.bf16.msra.mxu0 %v801_v48  ;;  %830 = vmatpush3.bf16.msra.mxu1 %v829_v52  ;;  %v443_v53 = vld [vmem:[%s1178_s7] sm:$0xff] }
  0x16   :  { %804 = vmatprep.subr.bf16.mxu0 %v803_v49  ;;  %831 = vmatprep.subr.bf16.mxu1 %v860_v4  ;;  %v844_v55 = vpack.c.bf16 %v444_v54, %v443_v53  ;;  %v654_v63 = vld [vmem:[%s1180_s6] ss:$0 sm:$0xff] }
  0x17   :  { %v655_v5 = vld [vmem:[%s1181_s8] ss:$0 sm:$0xff] }
  0x18   :  { %v559_v15 = vld [vmem:[%s1182_s11] sm:$0xff] }
  0x19   :  { %806 = vmatpush3.bf16.msra.mxu0 %v805_v57  ;;  %833 = vmatpush3.bf16.msra.mxu1 %v832_v61  ;;  %v653_v61 = vld [vmem:[%s1179_s5] ss:$0 sm:$0xff] }
  0x1a   :  { %808 = vmatprep.subr.bf16.mxu0 %v807_v58  ;;  %834 = vmatprep.subr.bf16.mxu1 %v860_v4  ;;  %v658_v22 = vld [vmem:[%s1183_s9] ss:$0 sm:$0xff] }
  0x1b   :  { %v659_v24 = vld [vmem:[%s1184_s10] ss:$0 sm:$0xff] }
  0x1d   :  { %810 = vmatpush3.bf16.msra.mxu0 %v809_v0  ;;  %836 = vmatpush3.bf16.msra.mxu1 %v835_v9 }
  0x1e   :  { %812 = vmatprep.subr.bf16.mxu0 %v811_v1  ;;  %837 = vmatprep.subr.bf16.mxu1 %v860_v4 }
  0x21   :  { %814 = vmatpush3.bf16.msra.mxu0 %v813_v7  ;;  %839 = vmatpush3.bf16.msra.mxu1 %v838_v18 }
  0x22   :  { %816 = vmatprep.subr.bf16.mxu0 %v815_v12  ;;  %840 = vmatprep.subr.bf16.mxu1 %v860_v4 }
  0x25   :  { %818 = vmatpush3.bf16.msra.mxu0 %v817_v16  ;;  %842 = vmatpush3.bf16.msra.mxu1 %v841_v21  ;;  %v560_v16 = vld [vmem:[%s1182_s11 + $0x8] sm:$0x3] }
  0x26   :  { %843 = vmatprep.subr.bf16.mxu0 %v860_v4  ;;  %847 = vmatprep.subr.bf16.mxu1 %v860_v4  ;;  %v848_v17 = vpack.c.bf16 %v560_v16, %v559_v15 }
  0xdb   :  { %v138_v31 = vpop.f32.mrb[0].mxu0  ;;  %v209_v34 = vpop.f32.mrb[0].mxu1 }
  0xdc   :  { %v139_v32 = vadd.f32 %v138_v31, %v56_v28  ;;  %v140_v33 = vpop.f32.mrb[1].mxu0  ;;  %v210_v36 = vadd.f32 %v209_v34, %v64_v30  ;;  %v730_v37 = vpop.f32.mrb[1].mxu1  ;;  %v660_v28 = vld [vmem:[%s1185_s12] ss:$0 sm:$0xff] }
  0xdd   :  { %v141_v35 = vadd.f32 %v140_v33, %v60_v29 }
  0xde   :  { %v215_v38 = vmax.f32 %v210_v36, 0.0  ;;  %v213_v39 = vmax.f32 %v139_v32, 0.0 }
  0xdf   :  { %v214_v4 = vmax.f32 %v141_v35, 0.0 }
  0xe0   :  { %764 = vmatmul.mubr.f32.vlgmr.msra.gmra.mrb[2].mxu1 %v215_v38 }
  0xe1   :  { %335 = vmatprep.mubr.f32.mxu0 %v214_v4  ;;  %777 = vmatprep.mubr.msk.f32.mxu1 %vm861_vm0, %v859_v3 }
  0xe2   :  { %336 = vmatmul.mubr.f32.vlgmr.msra.gmra.mrb[2].mxu0 %v213_v39  ;;  %850 = vmatpush3.bf16.msk.msra.mxu1 %vm1134_vm5, %v848_v17 }
  0xe3   :  { %770 = vmatprep.mubr.msk.f32.mxu0 %vm861_vm0, %v859_v3  ;;  %846 = vmatpush3.bf16.msk.msra.mxu0 %vm1134_vm5, %v844_v55 }
 0x1b3   :  { %v407_v40 = vpop.f32.mrb[2].mxu1 }
 0x1b4   :  { %v765_v42 = vpop.f32.mrb[3].mxu1 }
 0x1b5   :  { %v698_v41 = vpop.f32.mrb[2].mxu0 }
 0x1b6   :  { %v699_v43 = vpop.f32.mrb[3].mxu0 }
 0x1b7   :  { %v700_v45 = vadd.f32 %v699_v43, %v698_v41 }
 0x1b9   :  { %v338_v46 = vadd.f32 %v700_v45, %v652_v44 }
 0x1bb   :  { %v408_v47 = vadd.f32 %v407_v40, %v338_v46 }
 0x1bd   :  { %v414_v48 = vsel %vm413_vm2, %v408_v47, 0.0 }
 0x1be   :  { %415 = vadd.xlane.f32.xlu0 %v414_v48 }
 0x24b   :  { %v416_v49 = vpop.xlane.xlu0 %415 }
 0x24c   :  { %v418_v50 = vmul.f32 0.1, %v416_v49 }
 0x24e   :  { %v419_v51 = vsub.f32 %v408_v47, %v418_v50 }
 0x250   :  { %v420_v52 = vmul.f32 %v419_v51, %v419_v51 }
 0x252   :  { %v421_v3 = vsel %vm413_vm2, %v420_v52, 0.0 }
 0x253   :  { %422 = vadd.xlane.f32.xlu0 %v421_v3 }
 0x2e0   :  { %v423_v57 = vpop.xlane.xlu0 %422 }
 0x2e1   :  { %v424_v58 = vmul.f32 0.1, %v423_v57 }
 0x2e3   :  { %v425_v59 = vadd.f32 1e-05, %v424_v58 }
 0x2e5   :  { %855 = vrsqrt.f32 %v425_v59 }
 0x2ef   :  { %v856_v60 = vpop.eup %855 }
 0x2f0   :  { %v427_v62 = vmul.f32 %v856_v60, %v419_v51 }
 0x2f2   :  { %v434_v0 = vmul.f32 %v653_v61, %v427_v62 }
 0x2f4   :  { %v441_v1 = vadd.f32 %v654_v63, %v434_v0 }
 0x2f6   :  { %v442_v2 = vmax.f32 %v441_v1, 0.0 }
 0x2f8   :  { %771 = vmatmul.mubr.msk.f32.vlgmr.msra.gmra.mrb[4].mxu0 %vm413_vm2, %v442_v2 }
 0x3cb   :  { %v525_v6 = vpop.f32.mrb[4].mxu0 }
 0x3cc   :  { %v526_v7 = vadd.f32 %v655_v5, %v525_v6  ;;  %v772_v8 = vpop.f32.mrb[5].mxu0 }
 0x3ce   :  { %v531_v9 = vsel %vm413_vm2, %v526_v7, 0.0 }
 0x3cf   :  { %532 = vadd.xlane.f32.xlu1 %v531_v9 }
 0x45c   :  { %v533_v10 = vpop.xlane.xlu1 %532 }
 0x45d   :  { %v534_v11 = vmul.f32 0.1, %v533_v10 }
 0x45f   :  { %v535_v12 = vsub.f32 %v526_v7, %v534_v11 }
 0x461   :  { %v536_v13 = vmul.f32 %v535_v12, %v535_v12 }
 0x463   :  { %v537_v14 = vsel %vm413_vm2, %v536_v13, 0.0 }
 0x464   :  { %538 = vadd.xlane.f32.xlu1 %v537_v14 }
 0x4f1   :  { %v539_v18 = vpop.xlane.xlu1 %538 }
 0x4f2   :  { %v540_v19 = vmul.f32 0.1, %v539_v18 }
 0x4f4   :  { %v541_v20 = vadd.f32 1e-05, %v540_v19 }
 0x4f6   :  { %857 = vrsqrt.f32 %v541_v20 }
 0x500   :  { %v858_v21 = vpop.eup %857 }
 0x501   :  { %v543_v23 = vmul.f32 %v858_v21, %v535_v12 }
 0x503   :  { %v550_v25 = vmul.f32 %v658_v22, %v543_v23 }
 0x505   :  { %v557_v26 = vadd.f32 %v659_v24, %v550_v25 }
 0x507   :  { %v558_v27 = vmax.f32 %v557_v26, 0.0 }
 0x509   :  { %778 = vmatmul.mubr.msk.f32.vlgmr.msra.gmra.mrb[4].mxu1 %vm413_vm2, %v558_v27 }
 0x5dc   :  { %v640_v29 = vpop.f32.mrb[4].mxu1 }
 0x5dd   :  { %v641_v30 = vadd.f32 %v660_v28, %v640_v29  ;;  %v779_v31 = vpop.f32.mrb[5].mxu1 }
 0x5df   :  { %645 = vst.msk [vmem:[%s1186_s13] sm:$0xff] %vm644_vm6, %v641_v30 }

</bundles_post_ra>
